<compile_context>
chip_gen: v7x
topology: tpu7x:2x2x1
jax: 0.10.0
libtpu: 0.0.40
codegen_flags: <defaults>
</compile_context>

<pallas_src>
import functools
import math

import jax
import jax.numpy as jnp
from jax.experimental import pallas as pl
from jax.experimental.pallas import tpu as pltpu

LEAKY_SLOPE = 0.01      # PyTorch nn.LeakyReLU default negative_slope
LANE = 128              # TPU lane width
MAX_BLOCK_B = 2048      # upper bound on batch tile rows


def _round_up(n, m):
    return ((n + m - 1) // m) * m


def _leaky_relu_f32(x):
    return jnp.where(x >= 0, x, LEAKY_SLOPE * x)


# ----------------------------------------------------------------------------
# Kernel
# ----------------------------------------------------------------------------
def vn_corr_aggregator_cr_kernel(x_ref, w1_ref, b1_ref, w2_ref, b2_ref, o_ref):
    # x tile: (block_b, F) f32 -> cast to bf16 on the VPU right before the MXU.
    x = x_ref[...].astype(jnp.bfloat16)
    h = jnp.dot(x, w1_ref[...], preferred_element_type=jnp.float32)   # MXU, f32 acc
    h = _leaky_relu_f32(h + b1_ref[...])                              # f32 VPU epilogue
    h = h.astype(jnp.bfloat16)                                        # bf16 for 2nd MXU pass
    out = jnp.dot(h, w2_ref[...], preferred_element_type=jnp.float32) + b2_ref[...]
    # Narrow store: only the real out_dim columns are written back to HBM.
    o_ref[...] = out[:, : o_ref.shape[-1]].astype(o_ref.dtype)


# ----------------------------------------------------------------------------
# Tiling / VMEM heuristics
# ----------------------------------------------------------------------------
def _vmem_budget_bytes():
    """Generation-dependent VMEM budget (v7x 64 MiB/TC, v5e/v6e 128 MiB)."""
    fallback_cap = 64 << 20
    try:
        info = pltpu.get_tpu_info()
        cap = getattr(info, "vmem_capacity_bytes", None) or fallback_cap
    except Exception:  # hardware query unavailable -> conservative default
        cap = fallback_cap
    return min(max(cap - (8 << 20), 16 << 20), 100 << 20)


def _pick_block_b(B, F, out_pad, out_cols, vmem_budget, max_block=MAX_BLOCK_B):
    """Largest batch tile that fits VMEM while keeping an even, >=2-step grid."""
    if B <= 16:
        return max(8, _round_up(B, 8))   # tiny batch: single step

    # Even number of grid steps so v7x's 2 TCs split the work equally.
    pairs = pl.cdiv(B, 2 * max_block)
    blk = _round_up(pl.cdiv(B, 2 * pairs), 16)
    blk = min(blk, _round_up(B, 16), max_block)

    def vmem_bytes(b):
        x_tile = 2 * b * F * 4                 # f32 x, double-buffered
        out_tile = 2 * b * out_cols * 4        # f32 narrow out, double-buffered
        h_tmp = 2 * b * out_pad * 4            # f32 intermediate + bf16 copy headroom
        weights = 2 * ((F * out_pad + out_pad * out_pad) * 2 + 2 * out_pad * 4)
        return x_tile + out_tile + h_tmp + weights

    while blk > 16 and vmem_bytes(blk) > vmem_budget:
        blk = max(16, _round_up(blk // 2, 16))
    return blk


# ----------------------------------------------------------------------------
# pallas_call wrapper
# ----------------------------------------------------------------------------
@functools.partial(jax.jit, static_argnames=("block_b", "out_dim", "vmem_limit"))
def _forward_impl(x, w1p, b1p, w2p, b2p, *, block_b, out_dim, vmem_limit):
    B, F = x.shape
    out_pad = w1p.shape[1]
    grid = (pl.cdiv(B, block_b),)

    cost = pl.CostEstimate(
        flops=2 * B * (F * out_pad + out_pad * out_pad),   # padded dims = real MXU work
        transcendentals=0,
        bytes_accessed=(x.size * 4 + w1p.size * 2 + w2p.size * 2
                        + (b1p.size + b2p.size) * 4 + B * out_dim * 4),
    )

    return pl.pallas_call(
        vn_corr_aggregator_cr_kernel,
        out_shape=jax.ShapeDtypeStruct((B, out_dim), jnp.float32),
        grid_spec=pl.GridSpec(
            grid=grid,
            in_specs=[
                pl.BlockSpec((block_b, F), lambda i: (i, 0)),        # x tile (f32)
                pl.BlockSpec((F, out_pad), lambda i: (0, 0)),        # w1 (bf16, resident)
                pl.BlockSpec((1, out_pad), lambda i: (0, 0)),        # b1 (f32)
                pl.BlockSpec((out_pad, out_pad), lambda i: (0, 0)),  # w2 (bf16, resident)
                pl.BlockSpec((1, out_pad), lambda i: (0, 0)),        # b2 (f32)
            ],
            out_specs=pl.BlockSpec((block_b, out_dim), lambda i: (i, 0)),  # narrow out
        ),
        compiler_params=pltpu.CompilerParams(
            dimension_semantics=("parallel",),
            vmem_limit_bytes=vmem_limit,
        ),
        cost_estimate=cost,
    )(x, w1p, b1p, w2p, b2p)


def prepare_params(params):
    """One-time weight prep: pad out_dim to 128 lanes, cast weights to bf16."""
    out_dim = int(params["w1"].shape[1])
    out_pad = max(LANE, _round_up(out_dim, LANE))
    pad = out_pad - out_dim
    w1p = jnp.pad(params["w1"], ((0, 0), (0, pad))).astype(jnp.bfloat16)
    b1p = jnp.pad(params["b1"], ((0, 0), (0, pad))).astype(jnp.float32)
    w2p = jnp.pad(params["w2"], ((0, pad), (0, pad))).astype(jnp.bfloat16)
    b2p = jnp.pad(params["b2"], ((0, 0), (0, pad))).astype(jnp.float32)
    w1p, b1p, w2p, b2p = jax.block_until_ready((w1p, b1p, w2p, b2p))
    return {"w1": w1p, "b1": b1p, "w2": w2p, "b2": b2p, "out_dim": out_dim}


def vn_corr_aggregator_cr_forward(x, prepared, max_block=MAX_BLOCK_B):
    """x: (B, pc_feat_dim) f32.  prepared: output of prepare_params()."""
    B, F = x.shape
    out_dim = prepared["out_dim"]
    out_pad = prepared["w1"].shape[1]
    budget = _vmem_budget_bytes()
    blk = _pick_block_b(B, F, out_pad, out_dim, budget, max_block)
    return _forward_impl(x, prepared["w1"], prepared["b1"], prepared["w2"],
                         prepared["b2"], block_b=blk, out_dim=out_dim,
                         vmem_limit=budget)


# ----------------------------------------------------------------------------
# Params / references
# ----------------------------------------------------------------------------
def init_params(key, pc_feat_dim, out_dim):
    """PyTorch nn.Linear default init: U(-1/sqrt(fan_in), 1/sqrt(fan_in)).
    Weights stored (in, out) = transposed vs PyTorch's (out, in)."""
    def linear(key, fan_in, fan_out):
        kw, kb = jax.random.split(key)
        bound = 1.0 / math.sqrt(fan_in)
        w = jax.random.uniform(kw, (fan_in, fan_out), jnp.float32, -bound, bound)
        b = jax.random.uniform(kb, (1, fan_out), jnp.float32, -bound, bound)
        return w, b

    k1, k2 = jax.random.split(key)
    w1, b1 = linear(k1, pc_feat_dim, out_dim)
    w2, b2 = linear(k2, out_dim, out_dim)
    return {"w1": w1, "b1": b1, "w2": w2, "b2": b2}


def reference_forward_f32(x, p):
    h = _leaky_relu_f32(x @ p["w1"] + p["b1"])
    return h @ p["w2"] + p["b2"]


def reference_forward_bf16(x, p):
    # Mirrors the kernel's bf16-input / f32-accumulation matmul path.
    h = jnp.dot(x.astype(jnp.bfloat16), p["w1"].astype(jnp.bfloat16),
                preferred_element_type=jnp.float32) + p["b1"]
    h = _leaky_relu_f32(h)
    return jnp.dot(h.astype(jnp.bfloat16), p["w2"].astype(jnp.bfloat16),
                   preferred_element_type=jnp.float32) + p["b2"]


if __name__ == "__main__":
    key = jax.random.PRNGKey(0)
    k_x, k_p = jax.random.split(key)

    B = 256                 # -> 2 batch tiles of 128: even >=2-step grid (v7x 2 TCs)
    pc_feat_dim = 32
    out_dim = 8

    x = jax.random.normal(k_x, (B, pc_feat_dim), dtype=jnp.float32)
    params = init_params(k_p, pc_feat_dim, out_dim)
    prepared = prepare_params(params)   # one-time pad + bf16 cast

    out = jax.block_until_ready(vn_corr_aggregator_cr_forward(x, prepared))
    assert out.shape == (B, out_dim)

    # Exact-path check (same bf16-input matmuls, f32 accumulation).
    ref_lo = reference_forward_bf16(x, params)
    assert jnp.allclose(out, ref_lo, atol=1e-4, rtol=1e-4), \
        "mismatch vs bf16-matmul reference"

    # Sanity vs full-f32 reference (loose tolerance for bf16 matmul inputs).
    ref_f32 = reference_forward_f32(x, params)
    assert jnp.allclose(out, ref_f32, atol=5e-2, rtol=5e-2), \
        "mismatch vs f32 reference"

    # Non-divisible batch -> partial last tile handled by masked writeback.
    x2 = x[:200]
    out2 = jax.block_until_ready(vn_corr_aggregator_cr_forward(x2, prepared))
    assert jnp.allclose(out2, reference_forward_bf16(x2, params),
                        atol=1e-4, rtol=1e-4), \
        "mismatch on partial last batch tile"

    print("KERNEL_OK")
</pallas_src>

<mosaic_0001>
module attributes {stable_mosaic.version = 11 : i64} {
  func.func @vn_corr_aggregator_cr_kernel(%arg0: i32, %arg1: memref<128x32xf32, #tpu.memory_space<vmem>>, %arg2: memref<32x128xbf16, #tpu.memory_space<vmem>>, %arg3: memref<1x128xf32, #tpu.memory_space<vmem>>, %arg4: memref<128x128xbf16, #tpu.memory_space<vmem>>, %arg5: memref<1x128xf32, #tpu.memory_space<vmem>>, %arg6: memref<128x8xf32, #tpu.memory_space<vmem>>) attributes {dimension_semantics = [#tpu.dimension_semantics<parallel>], iteration_bounds = array<i64: 2>, scalar_prefetch = 0 : i64, scratch_operands = 0 : i64, tpu.core_type = #tpu.core_type<tc>, window_params = [{transform_indices = @transform_0, window_bounds = array<i64: 128, 32>}, {pipeline_mode = #tpu.pipeline_mode<synchronous>, transform_indices = @transform_1, window_bounds = array<i64: 32, 128>}, {pipeline_mode = #tpu.pipeline_mode<synchronous>, transform_indices = @transform_2, window_bounds = array<i64: 1, 128>}, {pipeline_mode = #tpu.pipeline_mode<synchronous>, transform_indices = @transform_3, window_bounds = array<i64: 128, 128>}, {pipeline_mode = #tpu.pipeline_mode<synchronous>, transform_indices = @transform_4, window_bounds = array<i64: 1, 128>}, {transform_indices = @transform_5, window_bounds = array<i64: 128, 8>}]} {
    %c0 = arith.constant 0 : index
    %c0_0 = arith.constant 0 : index
    %0 = vector.load %arg1[%c0, %c0_0] : memref<128x32xf32, #tpu.memory_space<vmem>>, vector<128x32xf32>
    %1 = arith.truncf %0 : vector<128x32xf32> to vector<128x32xbf16>
    %c0_1 = arith.constant 0 : index
    %c0_2 = arith.constant 0 : index
    %2 = vector.load %arg2[%c0_1, %c0_2] : memref<32x128xbf16, #tpu.memory_space<vmem>>, vector<32x128xbf16>
    %cst = arith.constant dense<0.000000e+00> : vector<128x128xf32>
    %3 = tpu.matmul %1, %2, %cst {dimension_numbers = #tpu.dot_dimension_numbers<[1], [0], [0], [1], [0, 0, 1, 1], [], []>} : vector<128x32xbf16>, vector<32x128xbf16>, vector<128x128xf32> -> vector<128x128xf32>
    %c0_3 = arith.constant 0 : index
    %c0_4 = arith.constant 0 : index
    %4 = vector.load %arg3[%c0_3, %c0_4] : memref<1x128xf32, #tpu.memory_space<vmem>>, vector<1x128xf32>
    %5 = vector.broadcast %4 : vector<1x128xf32> to vector<128x128xf32>
    %6 = arith.addf %3, %5 : vector<128x128xf32>
    %cst_5 = arith.constant 0.000000e+00 : f32
    %7 = vector.broadcast %cst_5 : f32 to vector<128x128xf32>
    %8 = arith.cmpf oge, %6, %7 : vector<128x128xf32>
    %cst_6 = arith.constant 0.00999999977 : f32
    %9 = vector.broadcast %cst_6 : f32 to vector<128x128xf32>
    %10 = arith.mulf %9, %6 : vector<128x128xf32>
    %11 = arith.select %8, %6, %10 : vector<128x128xi1>, vector<128x128xf32>
    %12 = arith.truncf %11 : vector<128x128xf32> to vector<128x128xbf16>
    %c0_7 = arith.constant 0 : index
    %c0_8 = arith.constant 0 : index
    %13 = vector.load %arg4[%c0_7, %c0_8] : memref<128x128xbf16, #tpu.memory_space<vmem>>, vector<128x128xbf16>
    %cst_9 = arith.constant dense<0.000000e+00> : vector<128x128xf32>
    %14 = tpu.matmul %12, %13, %cst_9 {dimension_numbers = #tpu.dot_dimension_numbers<[1], [0], [0], [1], [0, 0, 1, 1], [], []>} : vector<128x128xbf16>, vector<128x128xbf16>, vector<128x128xf32> -> vector<128x128xf32>
    %c0_10 = arith.constant 0 : index
    %c0_11 = arith.constant 0 : index
    %15 = vector.load %arg5[%c0_10, %c0_11] : memref<1x128xf32, #tpu.memory_space<vmem>>, vector<1x128xf32>
    %16 = vector.broadcast %15 : vector<1x128xf32> to vector<128x128xf32>
    %17 = arith.addf %14, %16 : vector<128x128xf32>
    %18 = vector.extract_strided_slice %17 {offsets = [0, 0], sizes = [128, 8], strides = [1, 1]} : vector<128x128xf32> to vector<128x8xf32>
    %c0_12 = arith.constant 0 : index
    %c0_13 = arith.constant 0 : index
    %19 = vector.load %arg6[%c0_12, %c0_13] : memref<128x8xf32, #tpu.memory_space<vmem>>, vector<128x8xf32>
    tpu.vector_store %arg6[%c0_12, %c0_13], %18 {strides = array<i32>} : memref<128x8xf32, #tpu.memory_space<vmem>>, vector<128x8xf32>,
    return
  }
  func.func @transform_0(%arg0: i32) -> (i32, i32) {
    %c0_i32 = arith.constant 0 : i32
    %c0_i32_0 = arith.constant 0 : i32
    return %arg0, %c0_i32 : i32, i32
  }
  func.func @transform_1(%arg0: i32) -> (i32, i32) {
    %c0_i32 = arith.constant 0 : i32
    %c0_i32_0 = arith.constant 0 : i32
    %c0_i32_1 = arith.constant 0 : i32
    return %c0_i32, %c0_i32_0 : i32, i32
  }
  func.func @transform_2(%arg0: i32) -> (i32, i32) {
    %c0_i32 = arith.constant 0 : i32
    %c0_i32_0 = arith.constant 0 : i32
    %c0_i32_1 = arith.constant 0 : i32
    return %c0_i32, %c0_i32_0 : i32, i32
  }
  func.func @transform_3(%arg0: i32) -> (i32, i32) {
    %c0_i32 = arith.constant 0 : i32
    %c0_i32_0 = arith.constant 0 : i32
    %c0_i32_1 = arith.constant 0 : i32
    return %c0_i32, %c0_i32_0 : i32, i32
  }
  func.func @transform_4(%arg0: i32) -> (i32, i32) {
    %c0_i32 = arith.constant 0 : i32
    %c0_i32_0 = arith.constant 0 : i32
    %c0_i32_1 = arith.constant 0 : i32
    return %c0_i32, %c0_i32_0 : i32, i32
  }
  func.func @transform_5(%arg0: i32) -> (i32, i32) {
    %c0_i32 = arith.constant 0 : i32
    %c0_i32_0 = arith.constant 0 : i32
    return %arg0, %c0_i32 : i32, i32
  }
}

</mosaic_0001>

<bundles_post_ra>
// kernel: _forward_impl.1
= control target key start
LH: loop header
LB: loop body
LE: loop exit
PB: predicated region body
PF: predicated region fallthrough
CT: control target
= control target key end

     0   :  { %s876_s18 = smov 0   ;;  %s1014_s0 = inlined_call_operand.vmem [shape: f32[256,32], index: 0, kind: input, shape index: {}]   ;;  %s1015_s1 = inlined_call_operand.vmem [shape: bf16[32,128], index: 1, kind: input, shape index: {}]   ;;  %s1016_s2 = inlined_call_operand.vmem [shape: f32[1,128], index: 2, kind: input, shape index: {}]   ;;  %s1017_s3 = inlined_call_operand.vmem [shape: bf16[128,128], index: 3, kind: input, shape index: {}]   ;;  %s1018_s4 = inlined_call_operand.vmem [shape: f32[1,128], index: 4, kind: input, shape index: {}]   ;;  %s1019_s5 = inlined_call_operand.vmem [shape: f32[256,8], index: 5, kind: output, shape index: {}]  }
   0x1 LB: > { %s695_s19 = sadd.s32 4294967295, %s844_s18   ;;  %p699_p0 = scmp.ge.s32.totalorder %s844_s18, 1  ;;  %s844_s18 = sphi %s876_s18, %s15_s18  }
   0x2   : > { %p188_p1 = scmp.lt.s32.totalorder %s844_s18, 3 }
   0x4   : > { %p189_p2 = pnand %p699_p0, %p188_p1 }
   0x5   : > { %v828_v0 = vld [vmem:[%s1015_s1] sm:$0xff] (!%p189_p2)   ;;  %s700_s22 = sshll.u32 (!%p189_p2), %s695_s19, 4  ;;  %v829_v1 = vld [vmem:[%s1015_s1 + $0x8] sm:$0xff] (!%p189_p2)   ;;  %v832_v4 = vld [vmem:[%s1017_s3 + $0x10] sm:$0xff] (!%p189_p2)   ;;  %vm276_vm0 = vcmask (!%p189_p2), 261120  }
   0x6   : > { %192 = sbr.rel (%p189_p2) target bundleno = 485 (0x1e5), region = 40  ;;  %p217_p3 = scmp.lt.s32.totalorder (!%p189_p2), %s700_s22, 31  ;;  %752 = vmatprep.subr.bf16.mxu0 (!%p189_p2), %v828_v0  ;;  %v830_v2 = vld [vmem:[%s1017_s3] sm:$0xff] (!%p189_p2)   ;;  %v831_v3 = vld [vmem:[%s1017_s3 + $0x8] sm:$0xff] (!%p189_p2)   ;;  %v833_v14 = vld [vmem:[%s1017_s3 + $0x18] sm:$0xff] (!%p189_p2)  }
   0x7   : > { %753 = vmatpush3.bf16.msra.mxu0 (!%p189_p2), %v828_v0  ;;  %804 = vmatprep.subr.bf16.mxu1 (!%p189_p2), %v830_v2  ;;  %v834_v21 = vld [vmem:[%s1017_s3 + $0x20] sm:$0xff] (!%p189_p2)   ;;  %v835_v31 = vld [vmem:[%s1017_s3 + $0x28] sm:$0xff] (!%p189_p2)   ;;  %v836_v32 = vld [vmem:[%s1017_s3 + $0x30] sm:$0xff] (!%p189_p2)  }
   0x8   : > { %754 = vmatprep.subr.bf16.mxu0 (!%p189_p2), %v829_v1  ;;  %812 = vmatpush3.bf16.msra.mxu1 (!%p189_p2), %v830_v2  ;;  %v837_v33 = vld [vmem:[%s1017_s3 + $0x38] sm:$0xff] (!%p189_p2)   ;;  %v951_v34 = vld [vmem:[%s1016_s2] ss:$0 sm:$0xff] (!%p189_p2) }
   0x9   : > { %805 = vmatprep.subr.bf16.mxu1 (!%p189_p2), %v831_v3 }
   0xb   : > { %755 = vmatpush3.bf16.msra.mxu0 (!%p189_p2), %v829_v1 }
   0xc   : > { %772 = vmatprep.subr.bf16.mxu0 (!%p189_p2), %v830_v2  ;;  %813 = vmatpush3.bf16.msra.mxu1 (!%p189_p2), %v831_v3 }
   0xd   : > { %s1021_s22 = smov (!%p217_p3, %s700_s22), 31  ;;  %806 = vmatprep.subr.bf16.mxu1 %v832_v4 }
   0xe   : > { %s701_s29 = sshll.u32 %s1021_s22, 3 }
   0xf   : > { %s904_s7 = scalar_lea.vmem %s1014_s0, %s701_s29  ;;  %s977_s28 = scalar_lea.vmem %s1019_s5, %s701_s29 }
  0x10   : > { %v229_v5 = vld [vmem:[%s904_s7] sm:$0xff]  ;;  %v230_v6 = vld [vmem:[%s904_s7 + $0x8] sm:$0xff]  ;;  %v231_v7 = vld [vmem:[%s904_s7 + $0x10] sm:$0xff]  ;;  %814 = vmatpush3.bf16.msra.mxu1 %v832_v4 }
  0x11   : > { %v245_v8 = vpack.c.bf16 %v230_v6, %v229_v5  ;;  %v232_v9 = vld [vmem:[%s904_s7 + $0x18] sm:$0xff]  ;;  %v233_v10 = vld [vmem:[%s904_s7 + $0x20] sm:$0xff]  ;;  %v234_v11 = vld [vmem:[%s904_s7 + $0x28] sm:$0xff]  ;;  %807 = vmatprep.subr.bf16.mxu1 %v833_v14 }
  0x12   : > { %v246_v12 = vpack.c.bf16 %v232_v9, %v231_v7  ;;  %v247_v13 = vpack.c.bf16 %v234_v11, %v233_v10  ;;  %v235_v15 = vld [vmem:[%s904_s7 + $0x30] sm:$0xff]  ;;  %v236_v16 = vld [vmem:[%s904_s7 + $0x38] sm:$0xff]  ;;  %v237_v17 = vld [vmem:[%s904_s7 + $0x40] sm:$0xff] }
  0x13   : > { %756 = vmatprep.mubr.msk.bf16.mxu0 %vm276_vm0, %v245_v8  ;;  %v238_v18 = vld [vmem:[%s904_s7 + $0x48] sm:$0xff]  ;;  %v248_v19 = vpack.c.bf16 %v236_v16, %v235_v15  ;;  %v239_v22 = vld [vmem:[%s904_s7 + $0x50] sm:$0xff]  ;;  %v240_v23 = vld [vmem:[%s904_s7 + $0x58] sm:$0xff] }
  0x14   : > { %757 = vmatmul.mubr.msk.bf16.vlgmr.msra.gmra.mrb[0].mxu0 %vm276_vm0, %v246_v12  ;;  %v249_v20 = vpack.c.bf16 %v238_v18, %v237_v17  ;;  %815 = vmatpush3.bf16.msra.mxu1 %v833_v14  ;;  %v241_v24 = vld [vmem:[%s904_s7 + $0x60] sm:$0xff]  ;;  %v242_v25 = vld [vmem:[%s904_s7 + $0x68] sm:$0xff]  ;;  %v250_v26 = vpack.c.bf16 %v240_v23, %v239_v22  ;;  %v243_v28 = vld [vmem:[%s904_s7 + $0x70] sm:$0xff] }
  0x15   : > { %760 = vmatprep.mubr.msk.bf16.mxu0 %vm276_vm0, %v247_v13  ;;  %773 = vmatpush3.bf16.msra.mxu0 %v830_v2  ;;  %v251_v27 = vpack.c.bf16 %v242_v25, %v241_v24  ;;  %v244_v29 = vld [vmem:[%s904_s7 + $0x78] sm:$0xff] }
  0x16   : > { %774 = vmatprep.subr.bf16.mxu0 %v831_v3  ;;  %808 = vmatprep.subr.bf16.mxu1 %v834_v21  ;;  %v252_v30 = vpack.c.bf16 %v244_v29, %v243_v28 }
  0x18   : > { %816 = vmatpush3.bf16.msra.mxu1 %v834_v21 }
  0x19   : > { %775 = vmatpush3.bf16.msra.mxu0 %v831_v3  ;;  %809 = vmatprep.subr.bf16.mxu1 %v835_v31 }
  0x1a   : > { %776 = vmatprep.subr.bf16.mxu0 %v832_v4 }
  0x1c   : > { %761 = vmatmul.mubr.msk.bf16.gmra.mrb[4].mxu0 %vm276_vm0, %v248_v19  ;;  %817 = vmatpush3.bf16.msra.mxu1 %v835_v31 }
  0x1d   : > { %764 = vmatprep.mubr.msk.bf16.mxu0 %vm276_vm0, %v249_v20  ;;  %777 = vmatpush3.bf16.msra.mxu0 %v832_v4 }
  0x1e   : > { %778 = vmatprep.subr.bf16.mxu0 %v833_v14  ;;  %810 = vmatprep.subr.bf16.mxu1 %v836_v32 }
  0x20   : > { %818 = vmatpush3.bf16.msra.mxu1 %v836_v32 }
  0x21   : > { %779 = vmatpush3.bf16.msra.mxu0 %v833_v14  ;;  %811 = vmatprep.subr.bf16.mxu1 %v837_v33 }
  0x22   : > { %780 = vmatprep.subr.bf16.mxu0 %v834_v21 }
  0x24   : > { %765 = vmatmul.mubr.msk.bf16.gmra.mrb[8].mxu0 %vm276_vm0, %v250_v26  ;;  %819 = vmatpush3.bf16.msra.mxu1 %v837_v33 }
  0x25   : > { %768 = vmatprep.mubr.msk.bf16.mxu0 %vm276_vm0, %v251_v27  ;;  %781 = vmatpush3.bf16.msra.mxu0 %v834_v21 }
  0x26   : > { %782 = vmatprep.subr.bf16.mxu0 %v835_v31 }
  0x29   : > { %783 = vmatpush3.bf16.msra.mxu0 %v835_v31 }
  0x2a   : > { %784 = vmatprep.subr.bf16.mxu0 %v836_v32 }
  0x2c   : > { %769 = vmatmul.mubr.msk.bf16.gmra.mrb[12].mxu0 %vm276_vm0, %v252_v30 }
  0x2d   : > { %785 = vmatpush3.bf16.msra.mxu0 %v836_v32 }
  0x2e   : > { %786 = vmatprep.subr.bf16.mxu0 %v837_v33 }
  0x31   : > { %787 = vmatpush3.bf16.msra.mxu0 %v837_v33 }
  0xe7   : > { %v758_v35 = vpop.f32.mrb[0].mxu0 }
  0xe8   : > { %v344_v36 = vadd.f32 %v758_v35, %v951_v34  ;;  %v335_v37 = vpop.f32.mrb[1].mxu0 }
  0xe9   : > { %v336_v38 = vadd.f32 %v951_v34, %v335_v37  ;;  %v759_v39 = vpop.f32.mrb[2].mxu0 }
  0xea   : > { %v416_v40 = vmul.f32 0.01, %v344_v36  ;;  %v347_v41 = vadd.f32 %v759_v39, %v951_v34  ;;  %v338_v42 = vpop.f32.mrb[3].mxu0  ;;  %vm400_vm1 = vcmp.ge.f32.partialorder %v344_v36, 0.0 }
  0xeb   : > { %v414_v43 = vmul.f32 0.01, %v336_v38  ;;  %v339_v44 = vadd.f32 %v951_v34, %v338_v42  ;;  %vm398_vm2 = vcmp.ge.f32.partialorder %v336_v38, 0.0 }
  0xec   : > { %vm401_vm3 = vcmp.ge.f32.partialorder %v347_v41, 0.0  ;;  %v417_v45 = vmul.f32 0.01, %v347_v41  ;;  %v432_v47 = vsel %vm400_vm1, %v344_v36, %v416_v40  ;;  %vm622_vm1 = vcmask 64512  }
  0xed   : > { %vm399_vm4 = vcmp.ge.f32.partialorder %v339_v44, 0.0  ;;  %v415_v46 = vmul.f32 0.01, %v339_v44  ;;  %v430_v51 = vsel %vm398_vm2, %v336_v38, %v414_v43 }
  0xee   : > { %v433_v48 = vsel %vm401_vm3, %v347_v41, %v417_v45 }
  0xef   : > { %v447_v49 = vpack.c.bf16 %v433_v48, %v432_v47  ;;  %v762_v50 = vpop.f32.mrb[4].mxu0  ;;  %v431_v52 = vsel %vm399_vm4, %v339_v44, %v415_v46  ;;  %v715_v44 = vld [vmem:[%s1018_s4] ss:$0 sm:$0xff] }
  0xf0   : > { %v360_v53 = vadd.f32 %v762_v50, %v951_v34  ;;  %v351_v54 = vpop.f32.mrb[5].mxu0  ;;  %v446_v55 = vpack.c.bf16 %v431_v52, %v430_v51 }
  0xf1   : > { %v352_v56 = vadd.f32 %v951_v34, %v351_v54  ;;  %v763_v57 = vpop.f32.mrb[6].mxu0 }
  0xf2   : > { %v420_v58 = vmul.f32 0.01, %v360_v53  ;;  %v363_v59 = vadd.f32 %v763_v57, %v951_v34  ;;  %v354_v60 = vpop.f32.mrb[7].mxu0  ;;  %788 = vmatprep.mubr.bf16.mxu0 %v446_v55  ;;  %vm404_vm5 = vcmp.ge.f32.partialorder %v360_v53, 0.0 }
  0xf3   : > { %v418_v61 = vmul.f32 0.01, %v352_v56  ;;  %v355_v62 = vadd.f32 %v951_v34, %v354_v60  ;;  %789 = vmatmul.mubr.bf16.vlgmr.msra.gmra.mrb[16].mxu0 %v447_v49  ;;  %vm402_vm7 = vcmp.ge.f32.partialorder %v352_v56, 0.0 }
  0xf4   : > { %vm405_vm6 = vcmp.ge.f32.partialorder %v363_v59, 0.0  ;;  %v421_v63 = vmul.f32 0.01, %v363_v59  ;;  %v436_v1 = vsel %vm404_vm5, %v360_v53, %v420_v58 }
  0xf5   : > { %v419_v0 = vmul.f32 0.01, %v355_v62  ;;  %vm403_vm8 = vcmp.ge.f32.partialorder %v355_v62, 0.0  ;;  %v434_v4 = vsel %vm402_vm7, %v352_v56, %v418_v61 }
  0xf6   : > { %v437_v2 = vsel %vm405_vm6, %v363_v59, %v421_v63 }
  0xf7   : > { %v766_v3 = vpop.f32.mrb[8].mxu0  ;;  %v435_v5 = vsel %vm403_vm8, %v355_v62, %v419_v0  ;;  %v449_v6 = vpack.c.bf16 %v437_v2, %v436_v1 }
  0xf8   : > { %v376_v7 = vadd.f32 %v766_v3, %v951_v34  ;;  %v367_v8 = vpop.f32.mrb[9].mxu0  ;;  %v448_v9 = vpack.c.bf16 %v435_v5, %v434_v4 }
  0xf9   : > { %v368_v10 = vadd.f32 %v951_v34, %v367_v8  ;;  %v767_v11 = vpop.f32.mrb[10].mxu0 }
  0xfa   : > { %v424_v12 = vmul.f32 0.01, %v376_v7  ;;  %v379_v13 = vadd.f32 %v767_v11, %v951_v34  ;;  %v370_v14 = vpop.f32.mrb[11].mxu0  ;;  %792 = vmatprep.mubr.bf16.mxu1 %v448_v9  ;;  %vm408_vm9 = vcmp.ge.f32.partialorder %v376_v7, 0.0 }
  0xfb   : > { %v422_v15 = vmul.f32 0.01, %v368_v10  ;;  %v371_v16 = vadd.f32 %v951_v34, %v370_v14  ;;  %793 = vmatmul.mubr.bf16.vlgmr.msra.gmra.mrb[0].mxu1 %v449_v6  ;;  %vm406_vm10 = vcmp.ge.f32.partialorder %v368_v10, 0.0 }
  0xfc   : > { %vm409_vm11 = vcmp.ge.f32.partialorder %v379_v13, 0.0  ;;  %v425_v17 = vmul.f32 0.01, %v379_v13  ;;  %v440_v19 = vsel %vm408_vm9, %v376_v7, %v424_v12 }
  0xfd   : > { %vm407_vm12 = vcmp.ge.f32.partialorder %v371_v16, 0.0  ;;  %v423_v18 = vmul.f32 0.01, %v371_v16  ;;  %v438_v22 = vsel %vm406_vm10, %v368_v10, %v422_v15 }
  0xfe   : > { %v441_v20 = vsel %vm409_vm11, %v379_v13, %v425_v17 }
  0xff   : > { %v770_v21 = vpop.f32.mrb[12].mxu0  ;;  %v439_v23 = vsel %vm407_vm12, %v371_v16, %v423_v18  ;;  %v451_v24 = vpack.c.bf16 %v441_v20, %v440_v19 }
 0x100   : > { %v392_v25 = vadd.f32 %v770_v21, %v951_v34  ;;  %v383_v26 = vpop.f32.mrb[13].mxu0  ;;  %v450_v27 = vpack.c.bf16 %v439_v23, %v438_v22 }
 0x101   : > { %v384_v28 = vadd.f32 %v951_v34, %v383_v26  ;;  %v771_v29 = vpop.f32.mrb[14].mxu0 }
 0x102   : > { %v428_v30 = vmul.f32 0.01, %v392_v25  ;;  %v395_v31 = vadd.f32 %v771_v29, %v951_v34  ;;  %v386_v32 = vpop.f32.mrb[15].mxu0  ;;  %796 = vmatprep.mubr.bf16.mxu1 %v450_v27  ;;  %vm412_vm13 = vcmp.ge.f32.partialorder %v392_v25, 0.0 }
 0x103   : > { %v426_v33 = vmul.f32 0.01, %v384_v28  ;;  %v387_v35 = vadd.f32 %v951_v34, %v386_v32  ;;  %797 = vmatmul.mubr.bf16.gmra.mrb[4].mxu1 %v451_v24  ;;  %vm410_vm14 = vcmp.ge.f32.partialorder %v384_v28, 0.0 }
 0x104   : > { %vm413_vm15 = vcmp.ge.f32.partialorder %v395_v31, 0.0  ;;  %v429_v36 = vmul.f32 0.01, %v395_v31  ;;  %v444_v38 = vsel %vm412_vm13, %v392_v25, %v428_v30 }
 0x105   : > { %vm411_vm0 = vcmp.ge.f32.partialorder %v387_v35, 0.0  ;;  %v427_v37 = vmul.f32 0.01, %v387_v35  ;;  %v442_v40 = vsel %vm410_vm14, %v384_v28, %v426_v33 }
 0x106   : > { %v445_v39 = vsel %vm413_vm15, %v395_v31, %v429_v36 }
 0x107   : > { %v443_v41 = vsel %vm411_vm0, %v387_v35, %v427_v37  ;;  %v453_v42 = vpack.c.bf16 %v445_v39, %v444_v38 }
 0x108   : > { %v452_v43 = vpack.c.bf16 %v443_v41, %v442_v40 }
 0x10a   : > { %800 = vmatprep.mubr.bf16.mxu1 %v452_v43 }
 0x10b   : > { %801 = vmatmul.mubr.bf16.gmra.mrb[8].mxu1 %v453_v42 }
 0x1c6   : > { %v790_v34 = vpop.f32.mrb[16].mxu0 }
 0x1c7   : > { %v568_v45 = vadd.f32 %v790_v34, %v715_v44  ;;  %v559_v46 = vpop.f32.mrb[17].mxu0 }
 0x1c8   : > { %v560_v47 = vadd.f32 %v715_v44, %v559_v46  ;;  %v791_v48 = vpop.f32.mrb[18].mxu0 }
 0x1c9   : > { %625 = vst.msk [vmem:[%s977_s28 + $0x10] sm:$0xff] %vm622_vm1, %v568_v45  ;;  %v571_v49 = vadd.f32 %v791_v48, %v715_v44  ;;  %v562_v50 = vpop.f32.mrb[19].mxu0 }
 0x1ca   : > { %623 = vst.msk [vmem:[%s977_s28] sm:$0xff] %vm622_vm1, %v560_v47  ;;  %v563_v51 = vadd.f32 %v715_v44, %v562_v50 }
 0x1cb   : > { %626 = vst.msk [vmem:[%s977_s28 + $0x18] sm:$0xff] %vm622_vm1, %v571_v49 }
 0x1cc   : > { %624 = vst.msk [vmem:[%s977_s28 + $0x8] sm:$0xff] %vm622_vm1, %v563_v51 }
 0x1ce   : > { %v794_v52 = vpop.f32.mrb[0].mxu1 }
 0x1cf   : > { %v584_v53 = vadd.f32 %v794_v52, %v715_v44  ;;  %v575_v54 = vpop.f32.mrb[1].mxu1 }
 0x1d0   : > { %v576_v55 = vadd.f32 %v715_v44, %v575_v54  ;;  %v795_v56 = vpop.f32.mrb[2].mxu1 }
 0x1d1   : > { %629 = vst.msk [vmem:[%s977_s28 + $0x30] sm:$0xff] %vm622_vm1, %v584_v53  ;;  %v587_v57 = vadd.f32 %v795_v56, %v715_v44  ;;  %v578_v58 = vpop.f32.mrb[3].mxu1 }
 0x1d2   : > { %627 = vst.msk [vmem:[%s977_s28 + $0x20] sm:$0xff] %vm622_vm1, %v576_v55  ;;  %v579_v59 = vadd.f32 %v715_v44, %v578_v58 }
 0x1d3   : > { %630 = vst.msk [vmem:[%s977_s28 + $0x38] sm:$0xff] %vm622_vm1, %v587_v57 }
 0x1d4   : > { %628 = vst.msk [vmem:[%s977_s28 + $0x28] sm:$0xff] %vm622_vm1, %v579_v59 }
 0x1d6   : > { %v798_v60 = vpop.f32.mrb[4].mxu1 }
 0x1d7   : > { %v600_v61 = vadd.f32 %v798_v60, %v715_v44  ;;  %v591_v62 = vpop.f32.mrb[5].mxu1 }
 0x1d8   : > { %v592_v63 = vadd.f32 %v715_v44, %v591_v62  ;;  %v799_v0 = vpop.f32.mrb[6].mxu1 }
 0x1d9   : > { %633 = vst.msk [vmem:[%s977_s28 + $0x50] sm:$0xff] %vm622_vm1, %v600_v61  ;;  %v603_v1 = vadd.f32 %v799_v0, %v715_v44  ;;  %v594_v2 = vpop.f32.mrb[7].mxu1 }
 0x1da   : > { %631 = vst.msk [vmem:[%s977_s28 + $0x40] sm:$0xff] %vm622_vm1, %v592_v63  ;;  %v595_v3 = vadd.f32 %v715_v44, %v594_v2 }
 0x1db   : > { %634 = vst.msk [vmem:[%s977_s28 + $0x58] sm:$0xff] %vm622_vm1, %v603_v1 }
 0x1dc   : > { %632 = vst.msk [vmem:[%s977_s28 + $0x48] sm:$0xff] %vm622_vm1, %v595_v3 }
 0x1de   : > { %v802_v4 = vpop.f32.mrb[8].mxu1 }
 0x1df   : > { %v616_v5 = vadd.f32 %v802_v4, %v715_v44  ;;  %v607_v6 = vpop.f32.mrb[9].mxu1 }
 0x1e0   : > { %v608_v7 = vadd.f32 %v715_v44, %v607_v6  ;;  %v803_v8 = vpop.f32.mrb[10].mxu1 }
 0x1e1   : > { %637 = vst.msk [vmem:[%s977_s28 + $0x70] sm:$0xff] %vm622_vm1, %v616_v5  ;;  %v619_v9 = vadd.f32 %v803_v8, %v715_v44  ;;  %v610_v10 = vpop.f32.mrb[11].mxu1 }
 0x1e2   : > { %635 = vst.msk [vmem:[%s977_s28 + $0x60] sm:$0xff] %vm622_vm1, %v608_v7  ;;  %v611_v11 = vadd.f32 %v715_v44, %v610_v10 }
 0x1e3   : > { %638 = vst.msk [vmem:[%s977_s28 + $0x78] sm:$0xff] %vm622_vm1, %v619_v9 }
 0x1e4   : > { %636 = vst.msk [vmem:[%s977_s28 + $0x68] sm:$0xff] %vm622_vm1, %v611_v11 }
 0x1e5 PF: > { %s15_s18 = sadd.s32 1, %s844_s18  }
 0x1e6   : > { %p12_p4 = scmp.ge.s32.totalorder %s15_s18, 4  }
 0x1e8   :  { %14 = sbr.rel (!%p12_p4) target bundleno = 1 (0x1), region = 70 }

</bundles_post_ra>
